<compile_context>
chip_gen: v7x
topology: tpu7x:2x2x1
jax: 0.10.0
libtpu: 0.0.40
codegen_flags: <defaults>
</compile_context>

<pallas_src>
import functools

import jax
import jax.numpy as jnp
from jax import lax
from jax.experimental import pallas as pl
from jax.experimental.pallas import tpu as pltpu


def _round_up(x, m):
    return ((x + m - 1) // m) * m


def _softplus_linear_kernel(x_ref, w_ref, b_ref, o_ref, acc_ref, *, training, clampval):
    k = pl.program_id(2)

    @pl.when(k == 0)
    def _init():
        acc_ref[...] = jnp.zeros_like(acc_ref)

    # (bm, bk) x (bn, bk) contracted over K on both operands -> (bm, bn).
    # No transpose: maps straight onto the MXU with f32 accumulation.
    acc_ref[...] += lax.dot_general(
        x_ref[...],
        w_ref[...],
        dimension_numbers=(((1,), (1,)), ((), ())),
        preferred_element_type=jnp.float32,
    )

    @pl.when(k == pl.num_programs(2) - 1)
    def _finalize():
        z = acc_ref[...] + b_ref[...]  # (1, bn) broadcasts over rows
        if training:
            z = jnp.clip(z, -clampval, clampval)
        # torch.nn.Softplus (beta=1, threshold=20), numerically stable.
        sp = jnp.where(z > 20.0, z, jnp.log1p(jnp.exp(jnp.minimum(z, 20.0))))
        o_ref[...] = sp.astype(o_ref.dtype)


def _vmem_estimate(bm, bn, bk, x_item, w_item, o_item):
    # Account for default double-buffering of every pipelined block plus the
    # f32 accumulator scratch; bias is negligible (add a small constant).
    return (
        2 * bm * bk * x_item      # x tile, double-buffered
        + 2 * bn * bk * w_item    # weight tile, double-buffered
        + 2 * bm * bn * o_item    # output tile, double-buffered
        + bm * bn * 4             # f32 accumulator scratch
        + (64 << 10)              # bias + slack
    )


def _choose_tiles(B, N, K, x_item, w_item, o_item, bm, bn, bk):
    # M tile: big (256) unless the batch itself is smaller; always a multiple of 8.
    if bm is None:
        bm = min(256, _round_up(B, 8))
    bm = max(8, _round_up(bm, 8))

    # N tile: keep the full class dim if it is modest (lane-dense stores either way);
    # otherwise tile in 512-wide (multiple of 128) chunks.
    if bn is None:
        bn = N if N <= 1024 else 512
    if bn != N:
        bn = max(128, _round_up(bn, 128))

    # K tile: keep the full reduction dim if modest; otherwise 2048-wide chunks.
    if bk is None:
        bk = K if K <= 2048 else 2048
    if bk != K:
        bk = max(128, _round_up(bk, 128))

    # Conservative working budget so tiles fit comfortably on every generation
    # (v7x: 64 MiB physical VMEM / 32 MiB default scoped).
    budget = 40 << 20
    while _vmem_estimate(bm, bn, bk, x_item, w_item, o_item) > budget:
        if bk > 512:
            bk = max(512, _round_up(bk // 2, 128))
        elif bm > 64:
            bm = max(64, _round_up(bm // 2, 8))
        elif bn > 512:
            bn = max(512, _round_up(bn // 2, 128))
        elif bm > 8:
            bm = max(8, _round_up(bm // 2, 8))
        else:
            break
    return bm, bn, bk


def softplus_linear(x, weight, bias, *, training=False, clampval=50.0,
                    bm=None, bn=None, bk=None):
    """x: (B, in_features); weight: (num_classes, in_features); bias: (num_classes,)."""
    B, K = x.shape
    N, Kw = weight.shape
    assert K == Kw, "weight in_features mismatch"
    assert bias.shape == (N,)

    x_item = jnp.dtype(x.dtype).itemsize
    w_item = jnp.dtype(weight.dtype).itemsize
    o_item = x_item

    bm, bn, bk = _choose_tiles(B, N, K, x_item, w_item, o_item, bm, bn, bk)

    # Pad every dim up to a tile multiple (zero padding does not change the matmul).
    B_pad = _round_up(B, bm)
    N_pad = _round_up(N, bn)
    K_pad = _round_up(K, bk)

    x_p = x if (B_pad == B and K_pad == K) else jnp.pad(x, ((0, B_pad - B), (0, K_pad - K)))
    w_p = weight if (N_pad == N and K_pad == K) else jnp.pad(
        weight, ((0, N_pad - N), (0, K_pad - K)))
    b_p = bias if N_pad == N else jnp.pad(bias, (0, N_pad - N))
    bias2d = b_p.reshape(1, N_pad)

    grid = (B_pad // bm, N_pad // bn, K_pad // bk)

    est = _vmem_estimate(bm, bn, bk, x_item, w_item, o_item)
    vmem_limit = int(min(max(2 * est, 32 << 20), 64 << 20))

    kernel = functools.partial(
        _softplus_linear_kernel, training=training, clampval=float(clampval))

    cost = pl.CostEstimate(
        flops=2 * B * N * K,
        transcendentals=2 * B * N,  # exp + log1p per output element
        bytes_accessed=int(B * K * x_item + N * K * w_item + N * w_item + B * N * o_item),
    )

    out = pl.pallas_call(
        kernel,
        out_shape=jax.ShapeDtypeStruct((B_pad, N_pad), x.dtype),
        grid_spec=pltpu.PrefetchScalarGridSpec(
            num_scalar_prefetch=0,
            grid=grid,
            in_specs=[
                pl.BlockSpec((bm, bk), lambda i, j, k: (i, k)),   # x row tile
                pl.BlockSpec((bn, bk), lambda i, j, k: (j, k)),   # weight tile (PyTorch layout)
                pl.BlockSpec((1, bn), lambda i, j, k: (0, j)),    # bias tile
            ],
            out_specs=pl.BlockSpec((bm, bn), lambda i, j, k: (i, j)),
            scratch_shapes=[pltpu.VMEM((bm, bn), jnp.float32)],
        ),
        compiler_params=pltpu.CompilerParams(
            dimension_semantics=("parallel", "parallel", "arbitrary"),
            vmem_limit_bytes=vmem_limit,
        ),
        cost_estimate=cost,
    )(x_p, w_p, bias2d)

    if B_pad != B or N_pad != N:
        out = out[:B, :N]
    return out


def init_params(key, in_features, num_classes, dtype=jnp.float32):
    # nn.init.kaiming_normal_(weight, nonlinearity='relu'):
    #   gain = sqrt(2), mode='fan_in' -> std = sqrt(2 / in_features)
    std = (2.0 / in_features) ** 0.5
    weight = std * jax.random.normal(key, (num_classes, in_features), dtype=dtype)
    bias = jnp.zeros((num_classes,), dtype=dtype)
    return weight, bias


def _softplus_ref(z):
    return jnp.where(z > 20.0, z, jnp.log1p(jnp.exp(jnp.minimum(z, 20.0))))


if __name__ == "__main__":
    # Deliberately non-multiple-of-tile shapes to exercise the padding path.
    B, in_features, num_classes = 10, 48, 10

    key = jax.random.PRNGKey(0)
    kx, kw, kb = jax.random.split(key, 3)

    x = jax.random.normal(kx, (B, in_features), dtype=jnp.float32)
    weight, bias = init_params(kw, in_features, num_classes)
    # Perturb bias so the bias-add path is actually tested (PyTorch init is zeros).
    bias = bias + 0.05 * jax.random.normal(kb, (num_classes,), dtype=jnp.float32)

    # eval-mode forward (PyTorch .eval(): softplus(h(x)))
    out = softplus_linear(x, weight, bias, training=False)
    jax.block_until_ready(out)

    z_ref = x @ weight.T + bias
    ref = _softplus_ref(z_ref)
    assert out.shape == (B, num_classes)
    assert jnp.allclose(out, ref, atol=1e-5, rtol=1e-5)

    # training-mode forward (clamp then softplus)
    out_tr = softplus_linear(x, weight, bias, training=True, clampval=50.0)
    jax.block_until_ready(out_tr)
    ref_tr = _softplus_ref(jnp.clip(z_ref, -50.0, 50.0))
    assert jnp.allclose(out_tr, ref_tr, atol=1e-5, rtol=1e-5)

    print("KERNEL_OK")
</pallas_src>

<mosaic_0001>
module attributes {stable_mosaic.version = 11 : i64} {
  func.func @_softplus_linear_kernel(%arg0: i32, %arg1: i32, %arg2: i32, %arg3: memref<16x48xf32, #tpu.memory_space<vmem>>, %arg4: memref<10x48xf32, #tpu.memory_space<vmem>>, %arg5: memref<1x10xf32, #tpu.memory_space<vmem>>, %arg6: memref<16x10xf32, #tpu.memory_space<vmem>>, %arg7: memref<16x10xf32, #tpu.memory_space<vmem>>) attributes {dimension_semantics = [#tpu.dimension_semantics<parallel>, #tpu.dimension_semantics<parallel>, #tpu.dimension_semantics<arbitrary>], iteration_bounds = array<i64: 1, 1, 1>, scalar_prefetch = 0 : i64, scratch_operands = 1 : i64, tpu.core_type = #tpu.core_type<tc>, window_params = [{transform_indices = @transform_0, window_bounds = array<i64: 16, 48>}, {transform_indices = @transform_1, window_bounds = array<i64: 10, 48>}, {transform_indices = @transform_2, window_bounds = array<i64: 1, 10>}, {transform_indices = @transform_3, window_bounds = array<i64: 16, 10>}]} {
    %c0_i32 = arith.constant 0 : i32
    %0 = arith.cmpi eq, %arg2, %c0_i32 : i32
    %1 = arith.extui %0 : i1 to i32
    %c0_i32_0 = arith.constant 0 : i32
    %2 = arith.cmpi ne, %1, %c0_i32_0 : i32
    scf.if %2 {
      %cst_10 = arith.constant 0.000000e+00 : f32
      %12 = vector.broadcast %cst_10 : f32 to vector<16x10xf32>
      %c0_11 = arith.constant 0 : index
      %c0_12 = arith.constant 0 : index
      %13 = vector.load %arg7[%c0_11, %c0_12] : memref<16x10xf32, #tpu.memory_space<vmem>>, vector<16x10xf32>
      tpu.vector_store %arg7[%c0_11, %c0_12], %12 {strides = array<i32>} : memref<16x10xf32, #tpu.memory_space<vmem>>, vector<16x10xf32>,
    } else {
    }
    %c0 = arith.constant 0 : index
    %c0_1 = arith.constant 0 : index
    %3 = vector.load %arg7[%c0, %c0_1] : memref<16x10xf32, #tpu.memory_space<vmem>>, vector<16x10xf32>
    %c0_2 = arith.constant 0 : index
    %c0_3 = arith.constant 0 : index
    %4 = vector.load %arg3[%c0_2, %c0_3] : memref<16x48xf32, #tpu.memory_space<vmem>>, vector<16x48xf32>
    %c0_4 = arith.constant 0 : index
    %c0_5 = arith.constant 0 : index
    %5 = vector.load %arg4[%c0_4, %c0_5] : memref<10x48xf32, #tpu.memory_space<vmem>>, vector<10x48xf32>
    %cst = arith.constant dense<0.000000e+00> : vector<16x10xf32>
    %6 = tpu.matmul %4, %5, %cst {dimension_numbers = #tpu.dot_dimension_numbers<[1], [1], [0], [0], [0, 0, 1, 0], [], []>} : vector<16x48xf32>, vector<10x48xf32>, vector<16x10xf32> -> vector<16x10xf32>
    %7 = arith.addf %3, %6 : vector<16x10xf32>
    %c0_6 = arith.constant 0 : index
    %c0_7 = arith.constant 0 : index
    %8 = vector.load %arg7[%c0_6, %c0_7] : memref<16x10xf32, #tpu.memory_space<vmem>>, vector<16x10xf32>
    tpu.vector_store %arg7[%c0_6, %c0_7], %7 {strides = array<i32>} : memref<16x10xf32, #tpu.memory_space<vmem>>, vector<16x10xf32>,
    %c0_i32_8 = arith.constant 0 : i32
    %9 = arith.cmpi eq, %arg2, %c0_i32_8 : i32
    %10 = arith.extui %9 : i1 to i32
    %c0_i32_9 = arith.constant 0 : i32
    %11 = arith.cmpi ne, %10, %c0_i32_9 : i32
    scf.if %11 {
      %c0_10 = arith.constant 0 : index
      %c0_11 = arith.constant 0 : index
      %12 = vector.load %arg7[%c0_10, %c0_11] : memref<16x10xf32, #tpu.memory_space<vmem>>, vector<16x10xf32>
      %c0_12 = arith.constant 0 : index
      %c0_13 = arith.constant 0 : index
      %13 = vector.load %arg5[%c0_12, %c0_13] : memref<1x10xf32, #tpu.memory_space<vmem>>, vector<1x10xf32>
      %14 = vector.broadcast %13 : vector<1x10xf32> to vector<16x10xf32>
      %15 = arith.addf %12, %14 : vector<16x10xf32>
      %cst_14 = arith.constant 2.000000e+01 : f32
      %16 = vector.broadcast %cst_14 : f32 to vector<16x10xf32>
      %17 = arith.cmpf ogt, %15, %16 : vector<16x10xf32>
      %cst_15 = arith.constant 2.000000e+01 : f32
      %18 = vector.broadcast %cst_15 : f32 to vector<16x10xf32>
      %19 = arith.minimumf %15, %18 : vector<16x10xf32>
      %20 = math.exp %19 : vector<16x10xf32>
      %21 = math.log1p %20 : vector<16x10xf32>
      %22 = arith.select %17, %15, %21 : vector<16x10xi1>, vector<16x10xf32>
      %c0_16 = arith.constant 0 : index
      %c0_17 = arith.constant 0 : index
      %23 = vector.load %arg6[%c0_16, %c0_17] : memref<16x10xf32, #tpu.memory_space<vmem>>, vector<16x10xf32>
      tpu.vector_store %arg6[%c0_16, %c0_17], %22 {strides = array<i32>} : memref<16x10xf32, #tpu.memory_space<vmem>>, vector<16x10xf32>,
    } else {
    }
    return
  }
  func.func @transform_0(%arg0: i32, %arg1: i32, %arg2: i32) -> (i32, i32) {
    %c0_i32 = arith.constant 0 : i32
    return %arg0, %arg2 : i32, i32
  }
  func.func @transform_1(%arg0: i32, %arg1: i32, %arg2: i32) -> (i32, i32) {
    %c0_i32 = arith.constant 0 : i32
    return %arg1, %arg2 : i32, i32
  }
  func.func @transform_2(%arg0: i32, %arg1: i32, %arg2: i32) -> (i32, i32) {
    %c0_i32 = arith.constant 0 : i32
    %c0_i32_0 = arith.constant 0 : i32
    return %c0_i32, %arg1 : i32, i32
  }
  func.func @transform_3(%arg0: i32, %arg1: i32, %arg2: i32) -> (i32, i32) {
    %c0_i32 = arith.constant 0 : i32
    return %arg0, %arg1 : i32, i32
  }
}

</mosaic_0001>

<bundles_post_ra>
// kernel: tpu_custom_call.1
= control target key start
LH: loop header
LB: loop body
LE: loop exit
PB: predicated region body
PF: predicated region fallthrough
CT: control target
= control target key end

     0   :  { %8 = vsyncpa [#allocation4], 0  ;;  %s399_s0 = inlined_call_operand.hbm [shape: f32[16,48], index: 0, kind: input, shape index: {}]   ;;  %s400_s1 = inlined_call_operand.hbm [shape: f32[10,48], index: 1, kind: input, shape index: {}]   ;;  %s401_s2 = inlined_call_operand.vmem [shape: f32[1,10], index: 2, kind: input, shape index: {}]   ;;  %s402_s3 = inlined_call_operand.hbm [shape: f32[16,10], index: 3, kind: output, shape index: {}]  }
   0x1   :  { %9 = vsyncpa [#allocation7], 0 }
   0x2   :  { %10 = vsyncpa [#allocation5], 0  ;;  %s319_s12 = smov [#allocation3]   ;;  %s247_s16 = scalar_lea.hbm %s399_s0, 256 }
   0x3   :  { %s16_s13 = sshll.u32 %s319_s12, 4  ;;  %p248_p0 = scmp.ne.s32.totalorder %s399_s0, %s247_s16  ;;  %s17_s13 = int_to_ptr.vmem [resolvable:$true] %s16_s13 }
   0x4   :  { %p251_p1 = scmp.lt.u32.totalorder %s247_s16, %s399_s0 }
   0x6   :  { %p253_p2 = pnand %p251_p1, %p248_p0 }
   0x8   :  { %256 = shalt.err (!%p253_p2)
}
   0x9   :  { %s257_s21 = scalar_lea.vmem %s17_s13, 256  ;;  %p262_p4 = scmp.lt.s32.totalorder %s17_s13, %s17_s13 }
   0xa   :  { %p258_p3 = scmp.ne.s32.totalorder %s17_s13, %s257_s21  ;;  %p263_p5 = scmp.lt.s32.totalorder %s257_s21, %s257_s21 }
   0xc   :  { %p264_p6 = por %p263_p5, %p262_p4 }
   0xe   :  { %p265_p7 = pnand %p264_p6, %p258_p3 }
  0x10   :  { %268 = shalt.err (!%p265_p7)
}
  0x11   :  { %s320_s22 = smov 128   ;;  %s321_s23 = smov 8  }
  0x12   :  { %22 = dma.hbm_to_vmem [thread:$0]  %s399_s0, 256, %s17_s13, [#allocation4], %s320_s22, %s320_s22, %s321_s23  }
  0x13   :  { %s322_s26 = smov [#allocation6]   ;;  %s269_s30 = scalar_lea.hbm %s400_s1, 256 }
  0x14   :  { %s28_s27 = sshll.u32 %s322_s26, 4  ;;  %p270_p8 = scmp.ne.s32.totalorder %s400_s1, %s269_s30  ;;  %s29_s27 = int_to_ptr.vmem [resolvable:$true] %s28_s27 }
  0x15   :  { %p273_p9 = scmp.lt.u32.totalorder %s269_s30, %s400_s1 }
  0x17   :  { %p275_p10 = pnand %p273_p9, %p270_p8 }
  0x19   :  { %278 = shalt.err (!%p275_p10)
}
  0x1a   :  { %s279_s8 = scalar_lea.vmem %s29_s27, 256  ;;  %p284_p12 = scmp.lt.s32.totalorder %s29_s27, %s29_s27 }
  0x1b   :  { %p280_p11 = scmp.ne.s32.totalorder %s29_s27, %s279_s8  ;;  %p285_p13 = scmp.lt.s32.totalorder %s279_s8, %s279_s8 }
  0x1d   :  { %p286_p0 = por %p285_p13, %p284_p12 }
  0x1f   :  { %p287_p1 = pnand %p286_p0, %p280_p11 }
  0x21   :  { %290 = shalt.err (!%p287_p1)
}
  0x22   :  { %34 = dma.hbm_to_vmem [thread:$0]  %s400_s1, 256, %s29_s27, [#allocation7], %s320_s22, %s320_s22, %s321_s23  }
  0x23   :  { %313 = dma.done.wait [#allocation4], 256  }
  0x24   :  { %314 = vsyncadd [#allocation4], 4294967040 }
  0x25   :  { %315 = dma.done.wait [#allocation7], 256  }
  0x26   :  { %316 = vsyncadd [#allocation7], 4294967040  ;;  %vm47_vm0 = vcmask 80896   ;;  %v323_v0 = vmov 0.0   ;;  %vm56_vm1 = vcmask 392192   ;;  %v54_v1 = vld [vmem:[#allocation6] sm:$0xff] }
  0x27   :  { %49 = vst.msk [vmem:[#allocation2 + $0x8] sm:$0xff] %vm47_vm0, %v323_v0  ;;  %48 = vst.msk [vmem:[#allocation2] sm:$0xff] %vm47_vm0, %v323_v0  ;;  %v55_v2 = vld [vmem:[#allocation6 + $0x8] sm:$0x3]  ;;  %v52_v3 = vld [vmem:[#allocation3] sm:$0xff] }
  0x28   :  { %vm228_vm2 = vmpackc.low %vm56_vm1, %vm56_vm1  ;;  %v227_v4 = vpack.c.bf16 %v55_v2, %v54_v1  ;;  %224 = vmatprep.mubr.msk.f32.mxu0 %vm56_vm1, %v52_v3  ;;  %v53_v5 = vld [vmem:[#allocation3 + $0x8] sm:$0xff]  ;;  %v215_v12 = vld [vmem:[%s401_s2] ss:$0 sm:$0xff]  ;;  %s324_s2 = smov [#allocation8]  }
  0x29   :  { %s198_s11 = sshll.u32 %s324_s2, 4  ;;  %s199_s11 = int_to_ptr.vmem [resolvable:$true] %s198_s11 }
  0x2a   :  { %229 = vmatprep.subr.msk.bf16.mxu0 %vm228_vm2, %v227_v4  ;;  %s291_s12 = scalar_lea.vmem %s199_s11, 256  ;;  %p296_p3 = scmp.lt.s32.totalorder %s199_s11, %s199_s11 }
  0x2b   :  { %232 = vmatpush3.bf16.xpose.msk.msra.mxu0 %vm228_vm2, %v227_v4  ;;  %p292_p2 = scmp.ne.s32.totalorder %s199_s11, %s291_s12  ;;  %p297_p4 = scmp.lt.s32.totalorder %s291_s12, %s291_s12 }
  0x2d   :  { %p298_p5 = por %p297_p4, %p296_p3 }
  0x2e   :  { %v51_v6 = vld [vmem:[#allocation2 + $0x8] sm:$0xff]  ;;  %v50_v7 = vld [vmem:[#allocation2] sm:$0xff] }
  0x2f   :  { %p299_p6 = pnand %p298_p5, %p292_p2 }
  0x32   :  { %225 = vmatmul.mubr.msk.f32.vlgmr.msra.gmra.mrb[0].mxu0 %vm56_vm1, %v53_v5 }
 0x105   :  { %v226_v8 = vpop.f32.mrb[0].mxu0 }
 0x106   :  { %v145_v9 = vadd.f32 %v226_v8, %v51_v6  ;;  %v135_v10 = vpop.f32.mrb[1].mxu0 }
 0x107   :  { %v144_v11 = vadd.f32 %v135_v10, %v50_v7 }
 0x108   :  { %148 = vst.msk [vmem:[#allocation2 + $0x8] sm:$0xff] %vm47_vm0, %v145_v9 }
 0x109   :  { %147 = vst.msk [vmem:[#allocation2] sm:$0xff] %vm47_vm0, %v144_v11 }
 0x10f   :  { %v153_v13 = vld [vmem:[#allocation2 + $0x8] sm:$0xff] }
 0x110   :  { %v152_v14 = vld [vmem:[#allocation2] sm:$0xff]  ;;  %v162_v15 = vadd.f32 %v215_v12, %v153_v13 }
 0x111   :  { %v161_v16 = vadd.f32 %v215_v12, %v152_v14 }
 0x112   :  { %v166_v17 = vmin.f32 %v162_v15, 20.0  ;;  %vm164_vm4 = vcmp.gt.f32.partialorder %v162_v15, 20.0 }
 0x113   :  { %v165_v18 = vmin.f32 %v161_v16, 20.0  ;;  %vm163_vm6 = vcmp.gt.f32.partialorder %v161_v16, 20.0 }
 0x114   :  { %v169_v19 = vmul.f32 1.442695, %v166_v17 }
 0x115   :  { %v167_v20 = vmul.f32 1.442695, %v165_v18 }
 0x116   :  { %239 = vpow2.f32 %v169_v19 }
 0x117   :  { %241 = vpow2.f32 %v167_v20 }
 0x120   :  { %v240_v21 = vpop.eup %239 }
 0x121   :  { %v242_v22 = vpop.eup %241  ;;  %v180_v23 = vadd.f32 1.0, %v240_v21  ;;  %v183_v25 = vmul.f32 -0.5, %v240_v21  ;;  %v186_v29 = vand.u32 2147483647, %v240_v21 }
 0x122   :  { %v171_v24 = vadd.f32 1.0, %v242_v22  ;;  %v174_v26 = vmul.f32 -0.5, %v242_v22  ;;  %v177_v30 = vand.u32 2147483647, %v242_v22 }
 0x123   :  { %243 = vlog2.f32 %v180_v23  ;;  %v184_v27 = vadd.f32 1.0, %v183_v25  ;;  %vm187_vm3 = vcmp.lt.f32.partialorder %v186_v29, 0.0004427343 }
 0x124   :  { %245 = vlog2.f32 %v171_v24  ;;  %v175_v28 = vadd.f32 1.0, %v174_v26  ;;  %vm178_vm5 = vcmp.lt.f32.partialorder %v177_v30, 0.0004427343 }
 0x125   :  { %v185_v34 = vmul.f32 %v240_v21, %v184_v27 }
 0x126   :  { %v176_v36 = vmul.f32 %v242_v22, %v175_v28 }
 0x12d   :  { %v244_v31 = vpop.eup %243 }
 0x12e   :  { %v246_v32 = vpop.eup %245  ;;  %v182_v33 = vmul.f32 0.6931472, %v244_v31 }
 0x12f   :  { %v173_v35 = vmul.f32 0.6931472, %v246_v32 }
 0x130   :  { %v188_v37 = vsel %vm187_vm3, %v185_v34, %v182_v33 }
 0x131   :  { %v179_v38 = vsel %vm178_vm5, %v176_v36, %v173_v35  ;;  %v190_v39 = vsel %vm164_vm4, %v162_v15, %v188_v37 }
 0x132   :  { %v189_v40 = vsel %vm163_vm6, %v161_v16, %v179_v38  ;;  %192 = vst.msk [vmem:[#allocation8 + $0x8] sm:$0xff] %vm47_vm0, %v190_v39 }
 0x133   :  { %191 = vst.msk [vmem:[#allocation8] sm:$0xff] %vm47_vm0, %v189_v40 }
 0x134   :  { %302 = shalt.err (!%p299_p6)
}
 0x135   :  { %s303_s15 = scalar_lea.hbm %s402_s3, 256 }
 0x136   :  { %p304_p7 = scmp.ne.s32.totalorder %s402_s3, %s303_s15  ;;  %p307_p8 = scmp.lt.u32.totalorder %s303_s15, %s402_s3 }
 0x138   :  { %p309_p9 = pnand %p307_p8, %p304_p7 }
 0x13a   :  { %312 = shalt.err (!%p309_p9)
}
 0x13b   :  { %204 = dma.vmem_to_hbm [thread:$0]  %s199_s11, 256, %s402_s3, [#allocation5], %s320_s22, %s320_s22, %s321_s23  }
 0x13c   :  { %317 = dma.done.wait [#allocation5], 256  }
 0x13d   :  { %318 = vsyncadd [#allocation5], 4294967040 }
 0x13e   :  { %208 = vsyncpa [#allocation4], 1 }
 0x13f   :  { %209 = vsyncpa [#allocation7], 1 }
 0x140   :  { %210 = vsyncpa [#allocation5], 1 }

</bundles_post_ra>
